<compile_context>
chip_gen: v6e
topology: v6e:2x2x1
jax: 0.10.0
libtpu: 0.0.40
codegen_flags: <defaults>
</compile_context>

<pallas_src>
import math

import jax
import jax.numpy as jnp
from jax.experimental import pallas as pl
from jax.experimental.pallas import tpu as pltpu

HIDDEN = 64
HEAD_DIM = 16
NUM_HEADS = 2                      # AttnBlock(hiddensize=64, 16, 2) -> head_dim=16, heads=2
INNER = HEAD_DIM * NUM_HEADS
LANE = 128


def _round_up(x, m):
    return ((x + m - 1) // m) * m


# ----------------------------------------------------------------------------------
# Pallas kernels (fused actor + critic, one batch tile per grid step)
# ----------------------------------------------------------------------------------
def _collapsed_net_trunk(x_bf16, w1, b1, wv, bv, wo, bo):
    """Collapsed Net up to (and including) the attention residual. Returns bf16 hidden."""
    h = jnp.dot(x_bf16, w1[...], preferred_element_type=jnp.float32) + b1[...]
    v = jnp.dot(h.astype(jnp.bfloat16), wv[...],
                preferred_element_type=jnp.float32) + bv[...]
    a = jnp.dot(v.astype(jnp.bfloat16), wo[...],
                preferred_element_type=jnp.float32)
    return (h + a + bo[...]).astype(jnp.bfloat16)


def _ac_continuous_kernel(x_ref,
                          w1a_ref, b1a_ref, wva_ref, bva_ref, woa_ref, boa_ref,
                          w1c_ref, b1c_ref, wvc_ref, bvc_ref, woc_ref, boc_ref,
                          w2a_ref, w2c_ref, b2_ref, out_ref):
    """Fused continuous actor Net + critic Net.  Output slab: [actor mean | value | 0 pad]."""
    x = x_ref[...].astype(jnp.bfloat16)
    ha = _collapsed_net_trunk(x, w1a_ref, b1a_ref, wva_ref, bva_ref, woa_ref, boa_ref)
    hc = _collapsed_net_trunk(x, w1c_ref, b1c_ref, wvc_ref, bvc_ref, woc_ref, boc_ref)
    # Both final linears target disjoint columns of one lane-dense 128-wide slab.
    y = (jnp.dot(ha, w2a_ref[...], preferred_element_type=jnp.float32)
         + jnp.dot(hc, w2c_ref[...], preferred_element_type=jnp.float32)
         + b2_ref[...])
    out_ref[...] = jnp.tanh(y)          # Tanh applies to both nets; pad columns stay 0.


def _ac_discrete_kernel(x_ref,
                        wa0, ba0, wa1, ba1, wa2, ba2, wa3, ba3, wa4, ba4, wa5, ba5,
                        w1c, b1c, wvc, bvc, woc, boc, w2c, b2c, out_ref):
    """Fused discrete actor MLP (outputs logits) + critic Net.

    Output slab columns: [0:A) actor logits, A critic value (tanh), rest 0.
    """
    x = x_ref[...].astype(jnp.bfloat16)

    # Discrete actor: 5x (Linear + Tanh) then final Linear -> logits (no softmax in-kernel).
    h = x
    for w, b in ((wa0, ba0), (wa1, ba1), (wa2, ba2), (wa3, ba3), (wa4, ba4)):
        h = jnp.tanh(jnp.dot(h, w[...], preferred_element_type=jnp.float32)
                     + b[...]).astype(jnp.bfloat16)
    logits_slab = jnp.dot(h, wa5[...], preferred_element_type=jnp.float32) + ba5[...]

    # Critic: collapsed Net (see module docstring).
    hc = _collapsed_net_trunk(x, w1c, b1c, wvc, bvc, woc, boc)
    crit_slab = jnp.tanh(jnp.dot(hc, w2c[...], preferred_element_type=jnp.float32) + b2c[...])

    out_ref[...] = logits_slab + crit_slab   # disjoint columns


# ----------------------------------------------------------------------------------
# Wrapper: batch-tiled, pipelined pallas_call
# ----------------------------------------------------------------------------------
def _fused_forward(kernel, state, kargs, out_pad):
    B, C = state.shape
    # Tile choice: 256/128 rows for large PPO batches (MXU-friendly, megacore shardable),
    # sublane-rounded for tiny inference batches.
    if B >= 512:
        tile_b = 256
    elif B >= 128:
        tile_b = 128
    else:
        tile_b = _round_up(B, 8)
    b_pad = _round_up(B, tile_b)
    if b_pad != B:
        state = jnp.pad(state, ((0, b_pad - B), (0, 0)))
    grid = (b_pad // tile_b,)

    in_specs = [pl.BlockSpec((tile_b, C), lambda i: (i, 0))]
    # Parameters: full-array blocks with a constant block index -> stay VMEM-resident
    # across grid steps (no re-DMA).
    in_specs += [pl.BlockSpec(a.shape, lambda i: (0, 0)) for a in kargs]

    out = pl.pallas_call(
        kernel,
        out_shape=jax.ShapeDtypeStruct((b_pad, out_pad), jnp.float32),
        grid=grid,
        in_specs=in_specs,
        out_specs=pl.BlockSpec((tile_b, out_pad), lambda i: (i, 0)),
        compiler_params=pltpu.CompilerParams(dimension_semantics=("parallel",)),
    )(state, *kargs)
    return out


# ----------------------------------------------------------------------------------
# Deterministic parameter init (PyTorch Linear default: U(-1/sqrt(fan_in), 1/sqrt(fan_in)))
# ----------------------------------------------------------------------------------
def _linear_params(key, fan_in, fan_out):
    kw, kb = jax.random.split(key)
    bound = 1.0 / math.sqrt(fan_in)
    w = jax.random.uniform(kw, (fan_in, fan_out), jnp.float32, -bound, bound)
    b = jax.random.uniform(kb, (1, fan_out), jnp.float32, -bound, bound)
    return w, b


def init_net_params(key, in_dim, out_dim, hidden=HIDDEN):
    # wq/bq/wk/bk are created for parity with the PyTorch AttnBlock's parameter set, but
    # since every token is an identical copy of the state vector they cannot affect the
    # forward pass (uniform softmax) and are not passed to the kernel.
    keys = jax.random.split(key, 6)
    w1, b1 = _linear_params(keys[0], in_dim, hidden)
    wq, bq = _linear_params(keys[1], hidden, INNER)
    wk, bk = _linear_params(keys[2], hidden, INNER)
    wv, bv = _linear_params(keys[3], hidden, INNER)
    wo, bo = _linear_params(keys[4], INNER, hidden)
    w2, b2 = _linear_params(keys[5], hidden, out_dim)
    return dict(w1=w1, b1=b1, wq=wq, bq=bq, wk=wk, bk=bk,
                wv=wv, bv=bv, wo=wo, bo=bo, w2=w2, b2=b2)


def init_discrete_actor_params(key, state_dim, action_dim):
    dims = [(state_dim, 256), (256, 256), (256, 256), (256, 256), (256, 256), (256, action_dim)]
    keys = jax.random.split(key, len(dims))
    return [_linear_params(k, fi, fo) for k, (fi, fo) in zip(keys, dims)]


# ----------------------------------------------------------------------------------
# Kernel-argument preparation: bf16 weights, f32 biases, lane-padded fused final layer
# ----------------------------------------------------------------------------------
def _prep_continuous(actor, critic, action_dim, out_pad):
    bf = lambda w: w.astype(jnp.bfloat16)
    hidden = actor["w2"].shape[0]
    w2a = jnp.zeros((hidden, out_pad), jnp.float32).at[:, :action_dim].set(actor["w2"])
    w2c = jnp.zeros((hidden, out_pad), jnp.float32).at[:, action_dim:action_dim + 1].set(critic["w2"])
    b2 = (jnp.zeros((1, out_pad), jnp.float32)
          .at[:, :action_dim].set(actor["b2"])
          .at[:, action_dim:action_dim + 1].set(critic["b2"]))
    return (bf(actor["w1"]), actor["b1"], bf(actor["wv"]), actor["bv"], bf(actor["wo"]), actor["bo"],
            bf(critic["w1"]), critic["b1"], bf(critic["wv"]), critic["bv"], bf(critic["wo"]), critic["bo"],
            bf(w2a), bf(w2c), b2)


def _prep_discrete(actor_layers, critic, action_dim, out_pad):
    bf = lambda w: w.astype(jnp.bfloat16)
    args = []
    for w, b in actor_layers[:5]:
        args += [bf(w), b]
    w5, b5 = actor_layers[5]
    wa5 = jnp.zeros((w5.shape[0], out_pad), jnp.float32).at[:, :action_dim].set(w5)
    ba5 = jnp.zeros((1, out_pad), jnp.float32).at[:, :action_dim].set(b5)
    args += [bf(wa5), ba5]
    hidden = critic["w2"].shape[0]
    w2c = jnp.zeros((hidden, out_pad), jnp.float32).at[:, action_dim:action_dim + 1].set(critic["w2"])
    b2c = jnp.zeros((1, out_pad), jnp.float32).at[:, action_dim:action_dim + 1].set(critic["b2"])
    args += [bf(critic["w1"]), critic["b1"], bf(critic["wv"]), critic["bv"],
             bf(critic["wo"]), critic["bo"], bf(w2c), b2c]
    return tuple(args)


# ----------------------------------------------------------------------------------
# ActorCritic (JAX port of the PyTorch module)
# ----------------------------------------------------------------------------------
class ActorCritic:
    def __init__(self, key, state_dim, action_dim, has_continuous_action_space, action_std_init):
        self.has_continuous_action_space = has_continuous_action_space
        self.state_dim = state_dim
        self.action_dim = action_dim
        self.out_pad = _round_up(action_dim + 1, LANE)   # actor cols + 1 critic col, lane-dense
        k_actor, k_critic = jax.random.split(key)
        self.critic_params = init_net_params(k_critic, state_dim, 1)
        if has_continuous_action_space:
            self.action_var = jnp.full((action_dim,), action_std_init * action_std_init,
                                       dtype=jnp.float32)
            self.actor_params = init_net_params(k_actor, state_dim, action_dim)
            self._kargs = _prep_continuous(self.actor_params, self.critic_params,
                                           action_dim, self.out_pad)
            self._kernel = _ac_continuous_kernel
        else:
            self.actor_params = init_discrete_actor_params(k_actor, state_dim, action_dim)
            self._kargs = _prep_discrete(self.actor_params, self.critic_params,
                                         action_dim, self.out_pad)
            self._kernel = _ac_discrete_kernel

    def set_action_std(self, new_action_std):
        if self.has_continuous_action_space:
            self.action_var = jnp.full((self.action_dim,), new_action_std * new_action_std,
                                       dtype=jnp.float32)

    @staticmethod
    def _maybe_batch(state):
        return state[None, :] if state.ndim == 1 else state

    def _forward(self, state):
        """One fused pallas_call -> (actor_out [mean or logits], critic value)."""
        B = state.shape[0]
        slab = _fused_forward(self._kernel, state, self._kargs, self.out_pad)
        a = self.action_dim
        return slab[:B, :a], slab[:B, a:a + 1]

    def _diag_gauss_logprob(self, action, mean):
        var = self.action_var
        k = self.action_dim
        return (-0.5 * jnp.sum((action - mean) ** 2 / var, axis=-1)
                - 0.5 * jnp.sum(jnp.log(var))
                - 0.5 * k * math.log(2.0 * math.pi))

    def _diag_gauss_entropy(self, batch):
        k = self.action_dim
        ent = 0.5 * k * (1.0 + math.log(2.0 * math.pi)) + 0.5 * jnp.sum(jnp.log(self.action_var))
        return jnp.full((batch,), ent, dtype=jnp.float32)

    def act(self, state, key):
        state = self._maybe_batch(state)
        actor_out, state_val = self._forward(state)
        if self.has_continuous_action_space:
            action_mean = actor_out
            std = jnp.sqrt(self.action_var)
            eps = jax.random.normal(key, action_mean.shape, jnp.float32)
            action = action_mean + std * eps
            logprob = self._diag_gauss_logprob(action, action_mean)
        else:
            logits = actor_out
            action = jax.random.categorical(key, logits, axis=-1)
            log_probs = jax.nn.log_softmax(logits, axis=-1)
            logprob = jnp.take_along_axis(log_probs, action[:, None], axis=-1)[:, 0]
        return action, logprob, state_val

    def evaluate(self, state, action):
        state = self._maybe_batch(state)
        actor_out, state_values = self._forward(state)
        if self.has_continuous_action_space:
            action_mean = actor_out
            if self.action_dim == 1:
                action = action.reshape(-1, self.action_dim)
            logprobs = self._diag_gauss_logprob(action, action_mean)
            entropy = self._diag_gauss_entropy(state.shape[0])
        else:
            log_probs = jax.nn.log_softmax(actor_out, axis=-1)
            logprobs = jnp.take_along_axis(log_probs, action[:, None], axis=-1)[:, 0]
            probs = jnp.exp(log_probs)
            entropy = -jnp.sum(probs * log_probs, axis=-1)
        return logprobs, state_values, entropy


# ----------------------------------------------------------------------------------
if __name__ == "__main__":
    key = jax.random.PRNGKey(0)
    k_ac, k_state, k_act, k_ac_d, k_act_d = jax.random.split(key, 5)

    B, state_dim, action_dim = 2, 8, 4
    state = jax.random.normal(k_state, (B, state_dim), jnp.float32)

    # Continuous-action ActorCritic (actor + critic fused into one Pallas kernel).
    ac = ActorCritic(k_ac, state_dim, action_dim,
                     has_continuous_action_space=True, action_std_init=0.6)
    action, logp, val = ac.act(state, k_act)
    logp_e, val_e, ent_e = ac.evaluate(state, action)

    # Discrete-action ActorCritic (MLP actor + Net critic fused into one Pallas kernel).
    ac_d = ActorCritic(k_ac_d, state_dim, action_dim,
                       has_continuous_action_space=False, action_std_init=0.6)
    action_d, logp_d, val_d = ac_d.act(state, k_act_d)
    logp_de, val_de, ent_de = ac_d.evaluate(state, action_d)

    # Large-batch (PPO-update style) evaluate exercises the batch-tiled grid path.
    big_b = 256
    big_state = jax.random.normal(jax.random.PRNGKey(1), (big_b, state_dim), jnp.float32)
    big_action = jax.random.normal(jax.random.PRNGKey(2), (big_b, action_dim), jnp.float32)
    logp_big, val_big, ent_big = ac.evaluate(big_state, big_action)

    for t in (action, logp, val, logp_e, val_e, ent_e,
              action_d, logp_d, val_d, logp_de, val_de, ent_de,
              logp_big, val_big, ent_big):
        jax.block_until_ready(t)

    print("KERNEL_OK")
</pallas_src>

<mosaic_0001>
module attributes {stable_mosaic.version = 11 : i64} {
  func.func @_ac_continuous_kernel(%arg0: i32, %arg1: memref<8x8xf32, #tpu.memory_space<vmem>>, %arg2: memref<8x64xbf16, #tpu.memory_space<vmem>>, %arg3: memref<1x64xf32, #tpu.memory_space<vmem>>, %arg4: memref<64x32xbf16, #tpu.memory_space<vmem>>, %arg5: memref<1x32xf32, #tpu.memory_space<vmem>>, %arg6: memref<32x64xbf16, #tpu.memory_space<vmem>>, %arg7: memref<1x64xf32, #tpu.memory_space<vmem>>, %arg8: memref<8x64xbf16, #tpu.memory_space<vmem>>, %arg9: memref<1x64xf32, #tpu.memory_space<vmem>>, %arg10: memref<64x32xbf16, #tpu.memory_space<vmem>>, %arg11: memref<1x32xf32, #tpu.memory_space<vmem>>, %arg12: memref<32x64xbf16, #tpu.memory_space<vmem>>, %arg13: memref<1x64xf32, #tpu.memory_space<vmem>>, %arg14: memref<64x128xbf16, #tpu.memory_space<vmem>>, %arg15: memref<64x128xbf16, #tpu.memory_space<vmem>>, %arg16: memref<1x128xf32, #tpu.memory_space<vmem>>, %arg17: memref<8x128xf32, #tpu.memory_space<vmem>>) attributes {dimension_semantics = [#tpu.dimension_semantics<parallel>], iteration_bounds = array<i64: 1>, scalar_prefetch = 0 : i64, scratch_operands = 0 : i64, tpu.core_type = #tpu.core_type<tc>, window_params = [{transform_indices = @transform_0, window_bounds = array<i64: 8, 8>}, {pipeline_mode = #tpu.pipeline_mode<synchronous>, transform_indices = @transform_1, window_bounds = array<i64: 8, 64>}, {pipeline_mode = #tpu.pipeline_mode<synchronous>, transform_indices = @transform_2, window_bounds = array<i64: 1, 64>}, {pipeline_mode = #tpu.pipeline_mode<synchronous>, transform_indices = @transform_3, window_bounds = array<i64: 64, 32>}, {pipeline_mode = #tpu.pipeline_mode<synchronous>, transform_indices = @transform_4, window_bounds = array<i64: 1, 32>}, {pipeline_mode = #tpu.pipeline_mode<synchronous>, transform_indices = @transform_5, window_bounds = array<i64: 32, 64>}, {pipeline_mode = #tpu.pipeline_mode<synchronous>, transform_indices = @transform_6, window_bounds = array<i64: 1, 64>}, {pipeline_mode = #tpu.pipeline_mode<synchronous>, transform_indices = @transform_7, window_bounds = array<i64: 8, 64>}, {pipeline_mode = #tpu.pipeline_mode<synchronous>, transform_indices = @transform_8, window_bounds = array<i64: 1, 64>}, {pipeline_mode = #tpu.pipeline_mode<synchronous>, transform_indices = @transform_9, window_bounds = array<i64: 64, 32>}, {pipeline_mode = #tpu.pipeline_mode<synchronous>, transform_indices = @transform_10, window_bounds = array<i64: 1, 32>}, {pipeline_mode = #tpu.pipeline_mode<synchronous>, transform_indices = @transform_11, window_bounds = array<i64: 32, 64>}, {pipeline_mode = #tpu.pipeline_mode<synchronous>, transform_indices = @transform_12, window_bounds = array<i64: 1, 64>}, {pipeline_mode = #tpu.pipeline_mode<synchronous>, transform_indices = @transform_13, window_bounds = array<i64: 64, 128>}, {pipeline_mode = #tpu.pipeline_mode<synchronous>, transform_indices = @transform_14, window_bounds = array<i64: 64, 128>}, {pipeline_mode = #tpu.pipeline_mode<synchronous>, transform_indices = @transform_15, window_bounds = array<i64: 1, 128>}, {transform_indices = @transform_16, window_bounds = array<i64: 8, 128>}]} {
    %c0 = arith.constant 0 : index
    %c0_0 = arith.constant 0 : index
    %0 = vector.load %arg1[%c0, %c0_0] : memref<8x8xf32, #tpu.memory_space<vmem>>, vector<8x8xf32>
    %1 = arith.truncf %0 : vector<8x8xf32> to vector<8x8xbf16>
    %c0_1 = arith.constant 0 : index
    %c0_2 = arith.constant 0 : index
    %2 = vector.load %arg2[%c0_1, %c0_2] : memref<8x64xbf16, #tpu.memory_space<vmem>>, vector<8x64xbf16>
    %cst = arith.constant dense<0.000000e+00> : vector<8x64xf32>
    %3 = tpu.matmul %1, %2, %cst {dimension_numbers = #tpu.dot_dimension_numbers<[1], [0], [0], [1], [0, 0, 1, 1], [], []>} : vector<8x8xbf16>, vector<8x64xbf16>, vector<8x64xf32> -> vector<8x64xf32>
    %c0_3 = arith.constant 0 : index
    %c0_4 = arith.constant 0 : index
    %4 = vector.load %arg3[%c0_3, %c0_4] : memref<1x64xf32, #tpu.memory_space<vmem>>, vector<1x64xf32>
    %5 = vector.broadcast %4 : vector<1x64xf32> to vector<8x64xf32>
    %6 = arith.addf %3, %5 : vector<8x64xf32>
    %7 = arith.truncf %6 : vector<8x64xf32> to vector<8x64xbf16>
    %c0_5 = arith.constant 0 : index
    %c0_6 = arith.constant 0 : index
    %8 = vector.load %arg4[%c0_5, %c0_6] : memref<64x32xbf16, #tpu.memory_space<vmem>>, vector<64x32xbf16>
    %cst_7 = arith.constant dense<0.000000e+00> : vector<8x32xf32>
    %9 = tpu.matmul %7, %8, %cst_7 {dimension_numbers = #tpu.dot_dimension_numbers<[1], [0], [0], [1], [0, 0, 1, 1], [], []>} : vector<8x64xbf16>, vector<64x32xbf16>, vector<8x32xf32> -> vector<8x32xf32>
    %c0_8 = arith.constant 0 : index
    %c0_9 = arith.constant 0 : index
    %10 = vector.load %arg5[%c0_8, %c0_9] : memref<1x32xf32, #tpu.memory_space<vmem>>, vector<1x32xf32>
    %11 = vector.broadcast %10 : vector<1x32xf32> to vector<8x32xf32>
    %12 = arith.addf %9, %11 : vector<8x32xf32>
    %13 = arith.truncf %12 : vector<8x32xf32> to vector<8x32xbf16>
    %c0_10 = arith.constant 0 : index
    %c0_11 = arith.constant 0 : index
    %14 = vector.load %arg6[%c0_10, %c0_11] : memref<32x64xbf16, #tpu.memory_space<vmem>>, vector<32x64xbf16>
    %cst_12 = arith.constant dense<0.000000e+00> : vector<8x64xf32>
    %15 = tpu.matmul %13, %14, %cst_12 {dimension_numbers = #tpu.dot_dimension_numbers<[1], [0], [0], [1], [0, 0, 1, 1], [], []>} : vector<8x32xbf16>, vector<32x64xbf16>, vector<8x64xf32> -> vector<8x64xf32>
    %16 = arith.addf %6, %15 : vector<8x64xf32>
    %c0_13 = arith.constant 0 : index
    %c0_14 = arith.constant 0 : index
    %17 = vector.load %arg7[%c0_13, %c0_14] : memref<1x64xf32, #tpu.memory_space<vmem>>, vector<1x64xf32>
    %18 = vector.broadcast %17 : vector<1x64xf32> to vector<8x64xf32>
    %19 = arith.addf %16, %18 : vector<8x64xf32>
    %20 = arith.truncf %19 : vector<8x64xf32> to vector<8x64xbf16>
    %c0_15 = arith.constant 0 : index
    %c0_16 = arith.constant 0 : index
    %21 = vector.load %arg8[%c0_15, %c0_16] : memref<8x64xbf16, #tpu.memory_space<vmem>>, vector<8x64xbf16>
    %cst_17 = arith.constant dense<0.000000e+00> : vector<8x64xf32>
    %22 = tpu.matmul %1, %21, %cst_17 {dimension_numbers = #tpu.dot_dimension_numbers<[1], [0], [0], [1], [0, 0, 1, 1], [], []>} : vector<8x8xbf16>, vector<8x64xbf16>, vector<8x64xf32> -> vector<8x64xf32>
    %c0_18 = arith.constant 0 : index
    %c0_19 = arith.constant 0 : index
    %23 = vector.load %arg9[%c0_18, %c0_19] : memref<1x64xf32, #tpu.memory_space<vmem>>, vector<1x64xf32>
    %24 = vector.broadcast %23 : vector<1x64xf32> to vector<8x64xf32>
    %25 = arith.addf %22, %24 : vector<8x64xf32>
    %26 = arith.truncf %25 : vector<8x64xf32> to vector<8x64xbf16>
    %c0_20 = arith.constant 0 : index
    %c0_21 = arith.constant 0 : index
    %27 = vector.load %arg10[%c0_20, %c0_21] : memref<64x32xbf16, #tpu.memory_space<vmem>>, vector<64x32xbf16>
    %cst_22 = arith.constant dense<0.000000e+00> : vector<8x32xf32>
    %28 = tpu.matmul %26, %27, %cst_22 {dimension_numbers = #tpu.dot_dimension_numbers<[1], [0], [0], [1], [0, 0, 1, 1], [], []>} : vector<8x64xbf16>, vector<64x32xbf16>, vector<8x32xf32> -> vector<8x32xf32>
    %c0_23 = arith.constant 0 : index
    %c0_24 = arith.constant 0 : index
    %29 = vector.load %arg11[%c0_23, %c0_24] : memref<1x32xf32, #tpu.memory_space<vmem>>, vector<1x32xf32>
    %30 = vector.broadcast %29 : vector<1x32xf32> to vector<8x32xf32>
    %31 = arith.addf %28, %30 : vector<8x32xf32>
    %32 = arith.truncf %31 : vector<8x32xf32> to vector<8x32xbf16>
    %c0_25 = arith.constant 0 : index
    %c0_26 = arith.constant 0 : index
    %33 = vector.load %arg12[%c0_25, %c0_26] : memref<32x64xbf16, #tpu.memory_space<vmem>>, vector<32x64xbf16>
    %cst_27 = arith.constant dense<0.000000e+00> : vector<8x64xf32>
    %34 = tpu.matmul %32, %33, %cst_27 {dimension_numbers = #tpu.dot_dimension_numbers<[1], [0], [0], [1], [0, 0, 1, 1], [], []>} : vector<8x32xbf16>, vector<32x64xbf16>, vector<8x64xf32> -> vector<8x64xf32>
    %35 = arith.addf %25, %34 : vector<8x64xf32>
    %c0_28 = arith.constant 0 : index
    %c0_29 = arith.constant 0 : index
    %36 = vector.load %arg13[%c0_28, %c0_29] : memref<1x64xf32, #tpu.memory_space<vmem>>, vector<1x64xf32>
    %37 = vector.broadcast %36 : vector<1x64xf32> to vector<8x64xf32>
    %38 = arith.addf %35, %37 : vector<8x64xf32>
    %39 = arith.truncf %38 : vector<8x64xf32> to vector<8x64xbf16>
    %c0_30 = arith.constant 0 : index
    %c0_31 = arith.constant 0 : index
    %40 = vector.load %arg14[%c0_30, %c0_31] : memref<64x128xbf16, #tpu.memory_space<vmem>>, vector<64x128xbf16>
    %cst_32 = arith.constant dense<0.000000e+00> : vector<8x128xf32>
    %41 = tpu.matmul %20, %40, %cst_32 {dimension_numbers = #tpu.dot_dimension_numbers<[1], [0], [0], [1], [0, 0, 1, 1], [], []>} : vector<8x64xbf16>, vector<64x128xbf16>, vector<8x128xf32> -> vector<8x128xf32>
    %c0_33 = arith.constant 0 : index
    %c0_34 = arith.constant 0 : index
    %42 = vector.load %arg15[%c0_33, %c0_34] : memref<64x128xbf16, #tpu.memory_space<vmem>>, vector<64x128xbf16>
    %cst_35 = arith.constant dense<0.000000e+00> : vector<8x128xf32>
    %43 = tpu.matmul %39, %42, %cst_35 {dimension_numbers = #tpu.dot_dimension_numbers<[1], [0], [0], [1], [0, 0, 1, 1], [], []>} : vector<8x64xbf16>, vector<64x128xbf16>, vector<8x128xf32> -> vector<8x128xf32>
    %44 = arith.addf %41, %43 : vector<8x128xf32>
    %c0_36 = arith.constant 0 : index
    %c0_37 = arith.constant 0 : index
    %45 = vector.load %arg16[%c0_36, %c0_37] : memref<1x128xf32, #tpu.memory_space<vmem>>, vector<1x128xf32>
    %46 = vector.broadcast %45 : vector<1x128xf32> to vector<8x128xf32>
    %47 = arith.addf %44, %46 : vector<8x128xf32>
    %48 = math.tanh %47 : vector<8x128xf32>
    %c0_38 = arith.constant 0 : index
    %c0_39 = arith.constant 0 : index
    %49 = vector.load %arg17[%c0_38, %c0_39] : memref<8x128xf32, #tpu.memory_space<vmem>>, vector<8x128xf32>
    tpu.vector_store %arg17[%c0_38, %c0_39], %48 {strides = array<i32>} : memref<8x128xf32, #tpu.memory_space<vmem>>, vector<8x128xf32>,
    return
  }
  func.func @transform_0(%arg0: i32) -> (i32, i32) {
    %c0_i32 = arith.constant 0 : i32
    %c0_i32_0 = arith.constant 0 : i32
    return %arg0, %c0_i32 : i32, i32
  }
  func.func @transform_1(%arg0: i32) -> (i32, i32) {
    %c0_i32 = arith.constant 0 : i32
    %c0_i32_0 = arith.constant 0 : i32
    %c0_i32_1 = arith.constant 0 : i32
    return %c0_i32, %c0_i32_0 : i32, i32
  }
  func.func @transform_2(%arg0: i32) -> (i32, i32) {
    %c0_i32 = arith.constant 0 : i32
    %c0_i32_0 = arith.constant 0 : i32
    %c0_i32_1 = arith.constant 0 : i32
    return %c0_i32, %c0_i32_0 : i32, i32
  }
  func.func @transform_3(%arg0: i32) -> (i32, i32) {
    %c0_i32 = arith.constant 0 : i32
    %c0_i32_0 = arith.constant 0 : i32
    %c0_i32_1 = arith.constant 0 : i32
    return %c0_i32, %c0_i32_0 : i32, i32
  }
  func.func @transform_4(%arg0: i32) -> (i32, i32) {
    %c0_i32 = arith.constant 0 : i32
    %c0_i32_0 = arith.constant 0 : i32
    %c0_i32_1 = arith.constant 0 : i32
    return %c0_i32, %c0_i32_0 : i32, i32
  }
  func.func @transform_5(%arg0: i32) -> (i32, i32) {
    %c0_i32 = arith.constant 0 : i32
    %c0_i32_0 = arith.constant 0 : i32
    %c0_i32_1 = arith.constant 0 : i32
    return %c0_i32, %c0_i32_0 : i32, i32
  }
  func.func @transform_6(%arg0: i32) -> (i32, i32) {
    %c0_i32 = arith.constant 0 : i32
    %c0_i32_0 = arith.constant 0 : i32
    %c0_i32_1 = arith.constant 0 : i32
    return %c0_i32, %c0_i32_0 : i32, i32
  }
  func.func @transform_7(%arg0: i32) -> (i32, i32) {
    %c0_i32 = arith.constant 0 : i32
    %c0_i32_0 = arith.constant 0 : i32
    %c0_i32_1 = arith.constant 0 : i32
    return %c0_i32, %c0_i32_0 : i32, i32
  }
  func.func @transform_8(%arg0: i32) -> (i32, i32) {
    %c0_i32 = arith.constant 0 : i32
    %c0_i32_0 = arith.constant 0 : i32
    %c0_i32_1 = arith.constant 0 : i32
    return %c0_i32, %c0_i32_0 : i32, i32
  }
  func.func @transform_9(%arg0: i32) -> (i32, i32) {
    %c0_i32 = arith.constant 0 : i32
    %c0_i32_0 = arith.constant 0 : i32
    %c0_i32_1 = arith.constant 0 : i32
    return %c0_i32, %c0_i32_0 : i32, i32
  }
  func.func @transform_10(%arg0: i32) -> (i32, i32) {
    %c0_i32 = arith.constant 0 : i32
    %c0_i32_0 = arith.constant 0 : i32
    %c0_i32_1 = arith.constant 0 : i32
    return %c0_i32, %c0_i32_0 : i32, i32
  }
  func.func @transform_11(%arg0: i32) -> (i32, i32) {
    %c0_i32 = arith.constant 0 : i32
    %c0_i32_0 = arith.constant 0 : i32
    %c0_i32_1 = arith.constant 0 : i32
    return %c0_i32, %c0_i32_0 : i32, i32
  }
  func.func @transform_12(%arg0: i32) -> (i32, i32) {
    %c0_i32 = arith.constant 0 : i32
    %c0_i32_0 = arith.constant 0 : i32
    %c0_i32_1 = arith.constant 0 : i32
    return %c0_i32, %c0_i32_0 : i32, i32
  }
  func.func @transform_13(%arg0: i32) -> (i32, i32) {
    %c0_i32 = arith.constant 0 : i32
    %c0_i32_0 = arith.constant 0 : i32
    %c0_i32_1 = arith.constant 0 : i32
    return %c0_i32, %c0_i32_0 : i32, i32
  }
  func.func @transform_14(%arg0: i32) -> (i32, i32) {
    %c0_i32 = arith.constant 0 : i32
    %c0_i32_0 = arith.constant 0 : i32
    %c0_i32_1 = arith.constant 0 : i32
    return %c0_i32, %c0_i32_0 : i32, i32
  }
  func.func @transform_15(%arg0: i32) -> (i32, i32) {
    %c0_i32 = arith.constant 0 : i32
    %c0_i32_0 = arith.constant 0 : i32
    %c0_i32_1 = arith.constant 0 : i32
    return %c0_i32, %c0_i32_0 : i32, i32
  }
  func.func @transform_16(%arg0: i32) -> (i32, i32) {
    %c0_i32 = arith.constant 0 : i32
    %c0_i32_0 = arith.constant 0 : i32
    return %arg0, %c0_i32 : i32, i32
  }
}

</mosaic_0001>

<bundles_post_ra>
// kernel: tpu_custom_call.1
= control target key start
LH: loop header
LB: loop body
LE: loop exit
PB: predicated region body
PF: predicated region fallthrough
CT: control target
= control target key end

     0   :  { %s1310_s0 = inlined_call_operand.hbm [shape: f32[8,8], index: 0, kind: input, shape index: {}]   ;;  %s1311_s1 = inlined_call_operand.hbm [shape: bf16[8,64], index: 1, kind: input, shape index: {}]   ;;  %s1312_s2 = inlined_call_operand.hbm [shape: f32[1,64], index: 2, kind: input, shape index: {}]   ;;  %s1313_s3 = inlined_call_operand.vmem [shape: bf16[64,32], index: 3, kind: input, shape index: {}]   ;;  %s1314_s4 = inlined_call_operand.hbm [shape: f32[1,32], index: 4, kind: input, shape index: {}]   ;;  %s1315_s5 = inlined_call_operand.vmem [shape: bf16[32,64], index: 5, kind: input, shape index: {}]   ;;  %s1316_s6 = inlined_call_operand.hbm [shape: f32[1,64], index: 6, kind: input, shape index: {}]   ;;  %s1317_s7 = inlined_call_operand.hbm [shape: bf16[8,64], index: 7, kind: input, shape index: {}]   ;;  %s1318_s8 = inlined_call_operand.hbm [shape: f32[1,64], index: 8, kind: input, shape index: {}]   ;;  %s1319_s9 = inlined_call_operand.vmem [shape: bf16[64,32], index: 9, kind: input, shape index: {}]   ;;  %s1320_s10 = inlined_call_operand.vmem [shape: f32[1,32], index: 10, kind: input, shape index: {}]   ;;  %s1321_s11 = inlined_call_operand.vmem [shape: bf16[32,64], index: 11, kind: input, shape index: {}]   ;;  %s1322_s12 = inlined_call_operand.vmem [shape: f32[1,64], index: 12, kind: input, shape index: {}]   ;;  %s1323_s13 = inlined_call_operand.vmem [shape: bf16[64,128], index: 13, kind: input, shape index: {}]   ;;  %s1324_s14 = inlined_call_operand.vmem [shape: bf16[64,128], index: 14, kind: input, shape index: {}]   ;;  %s1325_s15 = inlined_call_operand.vmem [shape: f32[1,128], index: 15, kind: input, shape index: {}]   ;;  %s1326_s16 = inlined_call_operand.hbm [shape: f32[8,128], index: 16, kind: output, shape index: {}]  }
   0x1   :  { %1327 = sst [smem:[#allocation20_spill]] %s1310_s0 }
   0x2   :  { %21 = vsyncpa [#allocation3], 0 }
   0x3   :  { %22 = vsyncpa [#allocation6], 0 }
   0x4   :  { %23 = vsyncpa [#allocation9], 0 }
   0x5   :  { %24 = vsyncpa [#allocation12], 0 }
   0x6   :  { %25 = vsyncpa [#allocation4], 0  ;;  %s1074_s21 = smov [#allocation5]   ;;  %s1075_s23 = smov [#allocation8]  }
   0x7   :  { %s42_s22 = sshll.u32 %s1074_s21, 4  ;;  %s64_s24 = sshll.u32 %s1075_s23, 4  ;;  %s43_s22 = int_to_ptr.vmem [resolvable:$true] %s42_s22  ;;  %s65_s24 = int_to_ptr.vmem [resolvable:$true] %s64_s24 }
   0x8   :  { %s912_s25 = scalar_lea.vmem %s43_s22, 64  ;;  %p917_p1 = scmp.lt.s32.totalorder %s43_s22, %s43_s22 }
   0x9   :  { %p913_p0 = scmp.ne.s32.totalorder %s43_s22, %s912_s25  ;;  %p918_p2 = scmp.lt.s32.totalorder %s912_s25, %s912_s25 }
   0xb   :  { %p919_p3 = por %p918_p2, %p917_p1 }
   0xd   :  { %p920_p4 = pnand %p919_p3, %p913_p0 }
   0xf   :  { %923 = shalt.err (!%p920_p4)
}
  0x10   :  { %45 = dma.hbm_to_vmem [thread:$0]  %s1311_s1, 64, %s43_s22, [#allocation6]  }
  0x11   :  { %s932_s28 = scalar_lea.vmem %s65_s24, 16  ;;  %s936_s29 = scalar_lea.vmem %s65_s24, 32 }
  0x12   :  { %p933_p5 = scmp.ne.s32.totalorder %s65_s24, %s932_s28  ;;  %p937_p6 = scmp.lt.s32.totalorder %s65_s24, %s65_s24 }
  0x13   :  { %p938_p7 = scmp.lt.s32.totalorder %s936_s29, %s932_s28 }
  0x15   :  { %p939_p8 = por %p938_p7, %p937_p6 }
  0x17   :  { %p940_p9 = pnand %p939_p8, %p933_p5 }
  0x19   :  { %943 = shalt.err (!%p940_p9)
}
  0x1a   :  { %67 = dma.hbm_to_vmem [thread:$0]  %s1314_s4, 16, %s65_s24, [#allocation9]  }
  0x1b   :  { %s1076_s17 = smov [#allocation11]   ;;  %s1077_s19 = smov [#allocation2]  }
  0x1c   :  { %s86_s18 = sshll.u32 %s1076_s17, 4  ;;  %s32_s20 = sshll.u32 %s1077_s19, 4  ;;  %s87_s18 = int_to_ptr.vmem [resolvable:$true] %s86_s18  ;;  %s33_s20 = int_to_ptr.vmem [resolvable:$true] %s32_s20 }
  0x1d   :  { %s952_s21 = scalar_lea.vmem %s87_s18, 64  ;;  %p957_p11 = scmp.lt.s32.totalorder %s87_s18, %s87_s18 }
  0x1e   :  { %p953_p10 = scmp.ne.s32.totalorder %s87_s18, %s952_s21  ;;  %p958_p12 = scmp.lt.s32.totalorder %s952_s21, %s952_s21 }
  0x20   :  { %p959_p13 = por %p958_p12, %p957_p11 }
  0x22   :  { %p960_p0 = pnand %p959_p13, %p953_p10 }
  0x24   :  { %963 = shalt.err (!%p960_p0)
}
  0x25   :  { %89 = dma.hbm_to_vmem [thread:$0]  %s1317_s7, 64, %s87_s18, [#allocation12]  }
  0x26   :  { %s972_s23 = scalar_lea.vmem %s33_s20, 128  ;;  %p977_p2 = scmp.lt.s32.totalorder %s33_s20, %s33_s20 }
  0x27   :  { %p973_p1 = scmp.ne.s32.totalorder %s33_s20, %s972_s23  ;;  %p978_p3 = scmp.lt.s32.totalorder %s972_s23, %s972_s23 }
  0x29   :  { %p979_p4 = por %p978_p3, %p977_p2 }
  0x2b   :  { %p980_p5 = pnand %p979_p4, %p973_p1 }
  0x2d   :  { %983 = shalt.err (!%p980_p5)
}
  0x2e   :  { %s1328_s25 = sld [smem:[#allocation20_spill]]  ;;  %s1078_s26 = smov [#allocation7]  }
  0x2f   :  { %s52_s27 = sshll.u32 %s1078_s26, 4  ;;  %s1079_s28 = smov [#allocation10]   ;;  %s53_s27 = int_to_ptr.vmem [resolvable:$true] %s52_s27 }
  0x30   :  { %s76_s29 = sshll.u32 %s1079_s28, 4  ;;  %s992_s30 = scalar_lea.vmem %s53_s27, 16  ;;  %s77_s29 = int_to_ptr.vmem [resolvable:$true] %s76_s29 }
  0x31   :  { %p993_p6 = scmp.ne.s32.totalorder %s53_s27, %s992_s30  ;;  %s996_s7 = scalar_lea.vmem %s53_s27, 32 }
  0x32   :  { %p997_p7 = scmp.lt.s32.totalorder %s53_s27, %s53_s27  ;;  %p998_p8 = scmp.lt.s32.totalorder %s996_s7, %s992_s30 }
  0x34   :  { %35 = dma.hbm_to_vmem [thread:$0]  %s1328_s25, 128, %s33_s20, [#allocation3]  }
  0x35   :  { %p999_p9 = por %p998_p8, %p997_p7 }
  0x37   :  { %p1000_p10 = pnand %p999_p9, %p993_p6 }
  0x39   :  { %1003 = shalt.err (!%p1000_p10)
}
  0x3a   :  { %55 = dma.hbm_to_vmem [thread:$0]  %s1312_s2, 16, %s53_s27, [#allocation6]  }
  0x3b   :  { %s1012_s18 = scalar_lea.vmem %s77_s29, 16  ;;  %s1016_s19 = scalar_lea.vmem %s77_s29, 32 }
  0x3c   :  { %p1013_p11 = scmp.ne.s32.totalorder %s77_s29, %s1012_s18  ;;  %p1017_p12 = scmp.lt.s32.totalorder %s77_s29, %s77_s29 }
  0x3d   :  { %p1018_p13 = scmp.lt.s32.totalorder %s1016_s19, %s1012_s18 }
  0x3f   :  { %p1019_p0 = por %p1018_p13, %p1017_p12 }
  0x41   :  { %p1020_p1 = pnand %p1019_p0, %p1013_p11 }
  0x43   :  { %1023 = shalt.err (!%p1020_p1)
}
  0x44   :  { %79 = dma.hbm_to_vmem [thread:$0]  %s1316_s6, 16, %s77_s29, [#allocation9]  }
  0x45   :  { %s1080_s1 = smov [#allocation13]  }
  0x46   :  { %s96_s22 = sshll.u32 %s1080_s1, 4  ;;  %s97_s22 = int_to_ptr.vmem [resolvable:$true] %s96_s22 }
  0x47   :  { %s1032_s23 = scalar_lea.vmem %s97_s22, 16  ;;  %s1036_s4 = scalar_lea.vmem %s97_s22, 32 }
  0x48   :  { %p1033_p2 = scmp.ne.s32.totalorder %s97_s22, %s1032_s23  ;;  %p1037_p3 = scmp.lt.s32.totalorder %s97_s22, %s97_s22 }
  0x49   :  { %p1038_p4 = scmp.lt.s32.totalorder %s1036_s4, %s1032_s23 }
  0x4b   :  { %p1039_p5 = por %p1038_p4, %p1037_p3 }
  0x4d   :  { %p1040_p6 = pnand %p1039_p5, %p1033_p2 }
  0x4f   :  { %1043 = shalt.err (!%p1040_p6)
}
  0x50   :  { %99 = dma.hbm_to_vmem [thread:$0]  %s1318_s8, 16, %s97_s22, [#allocation12]  }
  0x51   :  { %1064 = dma.done.wait [#allocation3], 128  }
  0x52   :  { %1065 = vsyncadd [#allocation3], 4294967168 }
  0x53   :  { %1066 = dma.done.wait [#allocation6], 80  }
  0x54   :  { %1067 = vsyncadd [#allocation6], 4294967216 }
  0x55   :  { %1068 = dma.done.wait [#allocation9], 32  }
  0x56   :  { %1069 = vsyncadd [#allocation9], 4294967264 }
  0x57   :  { %1070 = dma.done.wait [#allocation12], 80  }
  0x58   :  { %1071 = vsyncadd [#allocation12], 4294967216  ;;  %v1081_v0 = vmov 0.0   ;;  %vm1082_vm0 = vmmov 0   ;;  %vm150_vm1 = vcmask 1043456   ;;  %v136_v2 = vld [vmem:[#allocation2] sm:$0xff] }
  0x59   :  { %796 = vmatprep.subr.bf16.mxu0 %v1081_v0  ;;  %798 = vmatprep.mubr.msk.bf16.mxu0 %vm1082_vm0, %v1081_v0  ;;  %v138_v1 = vld [vmem:[#allocation5] sm:$0xf]  ;;  %v137_v4 = vpack.c.bf16 %v136_v2, %v136_v2  ;;  %vm146_vm2 = vcmask 64512   ;;  %v882_v5 = vld [vmem:[%s1313_s3 + $0x18] sm:$0xff]   ;;  %v883_v6 = vld [vmem:[%s1313_s3 + $0x10] sm:$0xff]   ;;  %vm234_vm3 = vcmask 523264  }
  0x5a   :  { %802 = vmatprep.subr.bf16.mxu1 %v1081_v0  ;;  %810 = vmatprep.mubr.msk.bf16.mxu1 %vm1082_vm0, %v1081_v0  ;;  %v152_v3 = vsel %vm150_vm1, %v138_v1, 0  ;;  %v884_v7 = vld [vmem:[%s1313_s3 + $0x8] sm:$0xff]   ;;  %v885_v8 = vld [vmem:[%s1313_s3] sm:$0xff]   ;;  %v888_v18 = vld [vmem:[%s1319_s9 + $0x18] sm:$0xff]   ;;  %vm295_vm4 = vcmask 261120  }
  0x5b   :  { %797 = vmatpush3.bf16.msra.mxu0 %v152_v3  ;;  %803 = vmatpush3.bf16.msra.mxu1 %v882_v5  ;;  %v886_v9 = vld [vmem:[%s1315_s5 + $0x8] sm:$0xff]   ;;  %v887_v17 = vld [vmem:[%s1315_s5] sm:$0xff]   ;;  %v349_v20 = vld [vmem:[#allocation11] sm:$0xf] }
  0x5c   :  { %814 = vmatprep.subr.bf16.mxu0 %v1081_v0  ;;  %804 = vmatprep.subr.bf16.mxu1 %v1081_v0  ;;  %v731_v10 = vld [vmem:[#allocation7] ss:$0 sm:$0xff]  ;;  %v733_v19 = vld [vmem:[#allocation8] ss:$0 sm:$0xff]  ;;  %v358_v24 = vsel %vm150_vm1, %v349_v20, 0  ;;  %v889_v28 = vld [vmem:[%s1319_s9 + $0x10] sm:$0xff]  }
  0x5d   :  { %v890_v29 = vld [vmem:[%s1319_s9 + $0x8] sm:$0xff]   ;;  %v891_v30 = vld [vmem:[%s1319_s9] sm:$0xff]   ;;  %v743_v36 = vld [vmem:[#allocation13] ss:$0 sm:$0xff] }
  0x5e   :  { %799 = vmatmul.mubr.msk.bf16.vlgmr.msra.gmra.mxu0 %vm146_vm2, %v137_v4  ;;  %v896_v31 = vld [vmem:[%s1321_s11 + $0x8] sm:$0xff]   ;;  %v892_v40 = vld [vmem:[%s1323_s13 + $0x18] sm:$0xff]   ;;  %v893_v44 = vld [vmem:[%s1323_s13 + $0x10] sm:$0xff]  }
  0x5f   :  { %818 = vmatprep.mubr.msk.bf16.mxu0 %vm1082_vm0, %v1081_v0  ;;  %805 = vmatpush3.bf16.msra.mxu1 %v883_v6  ;;  %v894_v45 = vld [vmem:[%s1323_s13 + $0x8] sm:$0xff]   ;;  %v742_v47 = vld [vmem:[#allocation10] ss:$0 sm:$0xff]  ;;  %v895_v48 = vld [vmem:[%s1323_s13] sm:$0xff]  }
  0x60   :  { %806 = vmatprep.subr.bf16.mxu1 %v1081_v0  ;;  %815 = vmatpush3.bf16.msra.mxu0 %v886_v9  ;;  %v897_v51 = vld [vmem:[%s1321_s11] sm:$0xff]   ;;  %v898_v56 = vld [vmem:[%s1324_s14 + $0x18] sm:$0xff]   ;;  %v899_v60 = vld [vmem:[%s1324_s14 + $0x10] sm:$0xff]  }
  0x61   :  { %816 = vmatprep.subr.bf16.mxu0 %v1081_v0  ;;  %v745_v52 = vld [vmem:[%s1320_s10] ss:$0 sm:$0xff]  ;;  %v900_v2 = vld [vmem:[%s1324_s14 + $0x8] sm:$0xff]  }
  0x62   :  { %v901_v3 = vld [vmem:[%s1324_s14] sm:$0xff]  }
  0x63   :  { %807 = vmatpush3.bf16.msra.mxu1 %v884_v7  ;;  %v754_v5 = vld [vmem:[%s1322_s12] ss:$0 sm:$0xff]  ;;  %s1083_s12 = smov [#allocation14]  }
  0x64   :  { %808 = vmatprep.subr.bf16.mxu1 %v1081_v0  ;;  %817 = vmatpush3.bf16.msra.mxu0 %v887_v17  ;;  %s719_s14 = sshll.u32 %s1083_s12, 4  ;;  %s720_s14 = int_to_ptr.vmem [resolvable:$true] %s719_s14 }
  0x65   :  { %822 = vmatprep.subr.bf16.mxu0 %v1081_v0  ;;  %s1044_s23 = scalar_lea.vmem %s720_s14, 128  ;;  %p1049_p8 = scmp.lt.s32.totalorder %s720_s14, %s720_s14 }
  0x66   :  { %p1045_p7 = scmp.ne.s32.totalorder %s720_s14, %s1044_s23  ;;  %p1050_p9 = scmp.lt.s32.totalorder %s1044_s23, %s1044_s23 }
  0x67   :  { %809 = vmatpush3.bf16.msra.mxu1 %v885_v8 }
  0x68   :  { %828 = vmatprep.subr.bf16.mxu1 %v1081_v0  ;;  %p1051_p10 = por %p1050_p9, %p1049_p8 }
  0x6a   :  { %p1052_p11 = pnand %p1051_p10, %p1045_p7 }
 0x11e   :  { %v188_v11 = vpop.f32.mrf.mxu0 }
 0x11f   :  { %v189_v12 = vadd.f32 %v731_v10, %v188_v11 }
 0x120   :  { %v800_v13 = vpop.f32.mrf.mxu0 }
 0x121   :  { %v194_v14 = vpack.c.bf16 %v189_v12, %v189_v12 }
 0x122   :  { %v191_v15 = vpop.f32.mrf.mxu0 }
 0x123   :  { %811 = vmatmul.mubr.msk.bf16.vlgmr.msra.gmra.mxu1 %vm234_vm3, %v194_v14 }
 0x124   :  { %v801_v16 = vpop.f32.mrf.mxu0  ;;  %836 = vmatprep.mubr.msk.bf16.mxu1 %vm1082_vm0, %v1081_v0  ;;  %829 = vmatpush3.bf16.msra.mxu1 %v888_v18 }
 0x125   :  { %830 = vmatprep.subr.bf16.mxu1 %v1081_v0 }
 0x128   :  { %831 = vmatpush3.bf16.msra.mxu1 %v889_v28 }
 0x129   :  { %832 = vmatprep.subr.bf16.mxu1 %v1081_v0 }
 0x12c   :  { %833 = vmatpush3.bf16.msra.mxu1 %v890_v29 }
 0x12d   :  { %834 = vmatprep.subr.bf16.mxu1 %v1081_v0 }
 0x130   :  { %835 = vmatpush3.bf16.msra.mxu1 %v891_v30 }
 0x131   :  { %860 = vmatprep.subr.bf16.mxu1 %v1081_v0 }
 0x1e3   :  { %v272_v21 = vpop.f32.mrf.mxu1 }
 0x1e4   :  { %v273_v22 = vadd.f32 %v733_v19, %v272_v21 }
 0x1e5   :  { %v812_v23 = vpop.f32.mrf.mxu1 }
 0x1e6   :  { %v278_v25 = vpack.c.bf16 %v273_v22, %v273_v22 }
 0x1e7   :  { %v275_v26 = vpop.f32.mrf.mxu1 }
 0x1e8   :  { %819 = vmatmul.mubr.msk.bf16.vlgmr.msra.gmra.mxu0 %vm295_vm4, %v278_v25 }
 0x1e9   :  { %823 = vmatpush3.bf16.msra.mxu0 %v358_v24  ;;  %v813_v27 = vpop.f32.mrf.mxu1  ;;  %824 = vmatprep.mubr.msk.bf16.mxu0 %vm1082_vm0, %v1081_v0 }
 0x1ea   :  { %840 = vmatprep.subr.bf16.mxu0 %v1081_v0 }
 0x1f0   :  { %825 = vmatmul.mubr.msk.bf16.vlgmr.msra.gmra.mxu0 %vm146_vm2, %v137_v4 }
 0x1f1   :  { %844 = vmatprep.mubr.msk.bf16.mxu0 %vm1082_vm0, %v1081_v0  ;;  %841 = vmatpush3.bf16.msra.mxu0 %v896_v31 }
 0x1f2   :  { %842 = vmatprep.subr.bf16.mxu0 %v1081_v0 }
 0x1f5   :  { %843 = vmatpush3.bf16.msra.mxu0 %v897_v51 }
 0x1f6   :  { %848 = vmatprep.subr.bf16.mxu0 %v1081_v0 }
 0x2a8   :  { %v333_v32 = vpop.f32.mrf.mxu0 }
 0x2a9   :  { %v339_v46 = vadd.f32 %v333_v32, %v189_v12 }
 0x2aa   :  { %v820_v33 = vpop.f32.mrf.mxu0 }
 0x2ab   :  { %v347_v49 = vadd.f32 %v742_v47, %v339_v46 }
 0x2ac   :  { %v336_v34 = vpop.f32.mrf.mxu0 }
 0x2ad   :  { %v348_v50 = vpack.c.bf16 %v347_v49, %v347_v49 }
 0x2ae   :  { %v821_v35 = vpop.f32.mrf.mxu0 }
 0x2b0   :  { %v394_v37 = vpop.f32.mrf.mxu0 }
 0x2b1   :  { %v395_v38 = vadd.f32 %v743_v36, %v394_v37 }
 0x2b2   :  { %v826_v39 = vpop.f32.mrf.mxu0 }
 0x2b3   :  { %v400_v41 = vpack.c.bf16 %v395_v38, %v395_v38 }
 0x2b4   :  { %v397_v42 = vpop.f32.mrf.mxu0 }
 0x2b5   :  { %837 = vmatmul.mubr.msk.bf16.vlgmr.msra.gmra.mxu1 %vm234_vm3, %v400_v41 }
 0x2b6   :  { %861 = vmatpush3.bf16.msra.mxu1 %v892_v40  ;;  %v827_v43 = vpop.f32.mrf.mxu0  ;;  %868 = vmatprep.mubr.msk.bf16.mxu1 %vm1082_vm0, %v1081_v0 }
 0x2b7   :  { %862 = vmatprep.subr.bf16.mxu1 %v1081_v0 }
 0x2ba   :  { %863 = vmatpush3.bf16.msra.mxu1 %v893_v44 }
 0x2bb   :  { %864 = vmatprep.subr.bf16.mxu1 %v1081_v0 }
 0x2be   :  { %865 = vmatpush3.bf16.msra.mxu1 %v894_v45 }
 0x2bf   :  { %866 = vmatprep.subr.bf16.mxu1 %v1081_v0 }
 0x2c2   :  { %867 = vmatpush3.bf16.msra.mxu1 %v895_v48 }
 0x2c5   :  { %869 = vmatmul.mubr.msk.bf16.vlgmr.msra.gmra.mxu1 %vm234_vm3, %v348_v50 }
 0x375   :  { %v477_v53 = vpop.f32.mrf.mxu1 }
 0x376   :  { %v478_v54 = vadd.f32 %v745_v52, %v477_v53 }
 0x377   :  { %v838_v55 = vpop.f32.mrf.mxu1 }
 0x378   :  { %v483_v57 = vpack.c.bf16 %v478_v54, %v478_v54 }
 0x379   :  { %v480_v58 = vpop.f32.mrf.mxu1 }
 0x37a   :  { %845 = vmatmul.mubr.msk.bf16.vlgmr.msra.gmra.mxu0 %vm295_vm4, %v483_v57 }
 0x37b   :  { %v839_v59 = vpop.f32.mrf.mxu1  ;;  %849 = vmatpush3.bf16.msra.mxu0 %v898_v56  ;;  %856 = vmatprep.mubr.msk.bf16.mxu0 %vm1082_vm0, %v1081_v0 }
 0x37c   :  { %850 = vmatprep.subr.bf16.mxu0 %v1081_v0 }
 0x37f   :  { %851 = vmatpush3.bf16.msra.mxu0 %v899_v60 }
 0x380   :  { %852 = vmatprep.subr.bf16.mxu0 %v1081_v0 }
 0x383   :  { %853 = vmatpush3.bf16.msra.mxu0 %v900_v2 }
 0x384   :  { %854 = vmatprep.subr.bf16.mxu0 %v1081_v0  ;;  %v765_v0 = vld [vmem:[%s1325_s15] ss:$0 sm:$0xff] }
 0x385   :  { %v697_v61 = vpop.f32.mrf.mxu1 }
 0x387   :  { %v870_v62 = vpop.f32.mrf.mxu1  ;;  %855 = vmatpush3.bf16.msra.mxu0 %v901_v3 }
 0x389   :  { %v700_v63 = vpop.f32.mrf.mxu1 }
 0x38b   :  { %v871_v1 = vpop.f32.mrf.mxu1 }
 0x43a   :  { %v537_v4 = vpop.f32.mrf.mxu0 }
 0x43b   :  { %v543_v6 = vadd.f32 %v537_v4, %v395_v38 }
 0x43c   :  { %v846_v7 = vpop.f32.mrf.mxu0 }
 0x43d   :  { %v551_v8 = vadd.f32 %v754_v5, %v543_v6 }
 0x43e   :  { %v540_v9 = vpop.f32.mrf.mxu0 }
 0x43f   :  { %v552_v10 = vpack.c.bf16 %v551_v8, %v551_v8 }
 0x440   :  { %v847_v11 = vpop.f32.mrf.mxu0 }
 0x441   :  { %857 = vmatmul.mubr.msk.bf16.vlgmr.msra.gmra.mxu0 %vm234_vm3, %v552_v10 }
 0x501   :  { %v630_v12 = vpop.f32.mrf.mxu0 }
 0x502   :  { %v698_v13 = vadd.f32 %v697_v61, %v630_v12 }
 0x503   :  { %v858_v14 = vpop.f32.mrf.mxu0 }
 0x504   :  { %v710_v15 = vadd.f32 %v765_v0, %v698_v13 }
 0x505   :  { %v633_v16 = vpop.f32.mrf.mxu0 }
 0x506   :  { %902 = vtanh.f32 %v710_v15 }
 0x507   :  { %v859_v17 = vpop.f32.mrf.mxu0 }
 0x513   :  { %v903_v18 = vpop.eup %902 }
 0x514   :  { %712 = vst [vmem:[#allocation14] sm:$0xff] %v903_v18 }
 0x515   :  { %1055 = shalt.err (!%p1052_p11)
}
 0x516   :  { %722 = dma.vmem_to_hbm [thread:$0]  %s720_s14, 128, %s1326_s16, [#allocation4]  }
 0x517   :  { %1072 = dma.done.wait [#allocation4], 128  }
 0x518   :  { %1073 = vsyncadd [#allocation4], 4294967168 }
 0x519   :  { %726 = vsyncpa [#allocation3], 1 }
 0x51a   :  { %727 = vsyncpa [#allocation6], 1 }
 0x51b   :  { %728 = vsyncpa [#allocation9], 1 }
 0x51c   :  { %729 = vsyncpa [#allocation12], 1 }
 0x51d   :  { %730 = vsyncpa [#allocation4], 1 }

</bundles_post_ra>
